<compile_context>
chip_gen: v7x
topology: tpu7x:2x2x1
jax: 0.10.0
libtpu: 0.0.40
codegen_flags: <defaults>
</compile_context>

<pallas_src>
import numpy as np
import jax
import jax.numpy as jnp
from jax import lax
from jax.experimental import pallas as pl
from jax.experimental.pallas import tpu as pltpu


# ----------------------------------------------------------------------------
# Schedule construction (plain numpy, identical math to the PyTorch reference)
# ----------------------------------------------------------------------------
def clip_noise_schedule(alphas2, margin=0.001):
    alphas2 = np.concatenate([np.ones(1), alphas2], axis=0)
    alphas_step = alphas2[1:] / alphas2[:-1]
    alphas_step = np.clip(alphas_step, a_min=margin, a_max=1.0)
    return np.cumprod(alphas_step, axis=0)


def polynomial_schedule(timesteps, s=1e-05, power=2.0):
    T = timesteps
    t = np.linspace(0, T, T + 1)
    alphas2 = (1 - np.power(t / T, power)) ** 2
    alphas2 = clip_noise_schedule(alphas2, margin=0.001)
    return (1 - 2 * s) * alphas2 + s


def make_gammas(timesteps):
    alphas2 = polynomial_schedule(timesteps, s=1e-05, power=2.0)
    gammas = np.log(1.0 - alphas2) - np.log(alphas2)
    return jnp.asarray(gammas, dtype=jnp.float32)  # shape (timesteps + 1,)


# ----------------------------------------------------------------------------
# Kernel 1: scalar SMEM gather (small batch).
#   t_ref:     (B,) int32   in SMEM (scalar prefetch)
#   table_ref: (N,) float32 in SMEM
#   out_ref:   (B,) float32 in SMEM
# ----------------------------------------------------------------------------
def _gather_scalar_kernel(t_ref, table_ref, out_ref):
    n = table_ref.shape[0]
    b = out_ref.shape[0]
    # B is small and static: the Python loop fully unrolls at trace time into
    # B scalar loads/stores on the scalar core.
    for i in range(b):
        ti = t_ref[i]
        # torch-style negative indexing, then clamp as a guard against
        # out-of-range timesteps (torch would raise; we clamp).
        idx = jnp.where(ti < 0, ti + n, ti)
        idx = jnp.clip(idx, 0, n - 1)
        out_ref[i] = table_ref[idx]


# ----------------------------------------------------------------------------
# Kernel 2: lane-dense tiled gather (large batch).
#   t_ref:     (1, TILE_B) int32    timestep indices (lane-major)
#   table_ref: (N, 1)      float32  gamma table (resident across the grid)
#   out_ref:   (1, TILE_B) float32  gathered gammas (lane-dense store)
# ----------------------------------------------------------------------------
def _gather_lane_kernel(t_ref, table_ref, out_ref):
    n = table_ref.shape[0]
    tile_b = out_ref.shape[1]

    t = t_ref[...]                                                  # (1, TILE_B)
    t = jnp.where(t < 0, t + n, t)
    t = jnp.clip(t, 0, n - 1)

    rows = lax.broadcasted_iota(jnp.int32, (n, tile_b), 0)          # (N, TILE_B)
    onehot = rows == t                                              # (N, TILE_B)
    sel = jnp.where(onehot, table_ref[...], jnp.float32(0.0))       # (N, TILE_B)
    # Sublane reduction -> lane-dense (1, TILE_B) output row.
    out_ref[...] = jnp.sum(sel, axis=0, keepdims=True)
    # TODO(synk): for very large N this could be reformulated as
    # table(1,N) @ onehot(N,TILE_B) on the MXU (precision=HIGHEST) to move the
    # select/reduce off the VPU/XLU.


_SCALAR_PATH_MAX_B = 128   # use the pure-SMEM scalar kernel up to this batch
_LANE_TILE_B = 256         # lane-major tile width for the large-batch kernel


class NoiseSchedule:
    """JAX/Pallas port of the PyTorch NoiseSchedule module."""

    def __init__(self, timesteps):
        self.timesteps = timesteps
        self.gammas = make_gammas(timesteps)              # (timesteps + 1,) f32
        self._n = int(self.gammas.shape[0])
        self._table_col = self.gammas.reshape(self._n, 1)  # (N, 1) for lane path
        # jit caches the traced pallas_call per batch shape; reshapes/pads fuse.
        self._forward = jax.jit(self._forward_impl)

    # -- public API ----------------------------------------------------------
    def __call__(self, t):
        t = jnp.asarray(t)
        assert not jnp.issubdtype(t.dtype, jnp.floating)
        return self._forward(t)

    # -- implementation ------------------------------------------------------
    def _forward_impl(self, t):
        b = t.shape[0]
        t32 = t.astype(jnp.int32)
        if b <= _SCALAR_PATH_MAX_B:
            return self._scalar_path(t32)
        return self._lane_path(t32)

    def _scalar_path(self, t32):
        b = t32.shape[0]
        return pl.pallas_call(
            _gather_scalar_kernel,
            out_shape=jax.ShapeDtypeStruct((b,), jnp.float32),
            grid_spec=pltpu.PrefetchScalarGridSpec(
                num_scalar_prefetch=1,                       # t -> SMEM
                grid=(1,),
                in_specs=[
                    pl.BlockSpec(memory_space=pltpu.MemorySpace.SMEM),  # table
                ],
                out_specs=pl.BlockSpec(memory_space=pltpu.MemorySpace.SMEM),
            ),
        )(t32, self.gammas)

    def _lane_path(self, t32):
        b = t32.shape[0]
        n = self._n
        tile = _LANE_TILE_B
        b_pad = ((b + tile - 1) // tile) * tile
        # Lane-major index row; pad with 0 (valid index), sliced off afterwards.
        t_row = jnp.pad(t32, (0, b_pad - b)).reshape(1, b_pad)

        out = pl.pallas_call(
            _gather_lane_kernel,
            out_shape=jax.ShapeDtypeStruct((1, b_pad), jnp.float32),
            grid_spec=pltpu.PrefetchScalarGridSpec(
                num_scalar_prefetch=0,
                grid=(b_pad // tile,),
                in_specs=[
                    pl.BlockSpec((1, tile), lambda i: (0, i)),   # t tiles
                    pl.BlockSpec((n, 1), lambda i: (0, 0)),      # table, resident
                ],
                out_specs=pl.BlockSpec((1, tile), lambda i: (0, i)),
            ),
            compiler_params=pltpu.CompilerParams(
                dimension_semantics=("parallel",)),
        )(t_row, self._table_col)
        return out[0, :b]


if __name__ == "__main__":
    timesteps = 1000
    schedule = NoiseSchedule(timesteps)

    key = jax.random.PRNGKey(0)
    k_small, k_large = jax.random.split(key)

    # Small batch -> scalar SMEM path.
    t_small = jax.random.randint(k_small, (8,), minval=0, maxval=timesteps + 1,
                                 dtype=jnp.int32)
    out_small = jax.block_until_ready(schedule(t_small))
    ref_small = jnp.take(schedule.gammas, t_small)
    np.testing.assert_allclose(np.asarray(out_small), np.asarray(ref_small),
                               rtol=1e-6, atol=1e-6)

    # Larger batch -> lane-dense tiled path.
    t_large = jax.random.randint(k_large, (512,), minval=0, maxval=timesteps + 1,
                                 dtype=jnp.int32)
    out_large = jax.block_until_ready(schedule(t_large))
    ref_large = jnp.take(schedule.gammas, t_large)
    np.testing.assert_allclose(np.asarray(out_large), np.asarray(ref_large),
                               rtol=1e-6, atol=1e-6)

    print("KERNEL_OK")
</pallas_src>

<mosaic_0001>
module attributes {stable_mosaic.version = 11 : i64} {
  func.func @_gather_scalar_kernel(%arg0: i32, %arg1: memref<8xi32, #tpu.memory_space<smem>>, %arg2: memref<1001xf32, #tpu.memory_space<smem>>, %arg3: memref<8xf32, #tpu.memory_space<smem>>) attributes {dimension_semantics = [#tpu.dimension_semantics<arbitrary>], iteration_bounds = array<i64: 1>, scalar_prefetch = 1 : i64, scratch_operands = 0 : i64, tpu.core_type = #tpu.core_type<tc>, window_params = [{transform_indices = @transform_0, window_bounds = array<i64: 1001>}, {transform_indices = @transform_1, window_bounds = array<i64: 8>}]} {
    %c0 = arith.constant 0 : index
    %0 = memref.load %arg1[%c0] : memref<8xi32, #tpu.memory_space<smem>>
    %c0_i32 = arith.constant 0 : i32
    %1 = arith.cmpi slt, %0, %c0_i32 : i32
    %c1001_i32 = arith.constant 1001 : i32
    %2 = arith.addi %0, %c1001_i32 : i32
    %3 = arith.select %1, %2, %0 : i32
    %c0_i32_0 = arith.constant 0 : i32
    %c1000_i32 = arith.constant 1000 : i32
    %4 = arith.maxsi %c0_i32_0, %3 : i32
    %5 = arith.minsi %c1000_i32, %4 : i32
    %6 = arith.index_cast %5 : i32 to index
    %7 = memref.load %arg2[%6] : memref<1001xf32, #tpu.memory_space<smem>>
    %c0_1 = arith.constant 0 : index
    %8 = memref.load %arg3[%c0_1] : memref<8xf32, #tpu.memory_space<smem>>
    memref.store %7, %arg3[%c0_1] : memref<8xf32, #tpu.memory_space<smem>>
    %c1 = arith.constant 1 : index
    %9 = memref.load %arg1[%c1] : memref<8xi32, #tpu.memory_space<smem>>
    %c0_i32_2 = arith.constant 0 : i32
    %10 = arith.cmpi slt, %9, %c0_i32_2 : i32
    %c1001_i32_3 = arith.constant 1001 : i32
    %11 = arith.addi %9, %c1001_i32_3 : i32
    %12 = arith.select %10, %11, %9 : i32
    %c0_i32_4 = arith.constant 0 : i32
    %c1000_i32_5 = arith.constant 1000 : i32
    %13 = arith.maxsi %c0_i32_4, %12 : i32
    %14 = arith.minsi %c1000_i32_5, %13 : i32
    %15 = arith.index_cast %14 : i32 to index
    %16 = memref.load %arg2[%15] : memref<1001xf32, #tpu.memory_space<smem>>
    %c1_6 = arith.constant 1 : index
    %17 = memref.load %arg3[%c1_6] : memref<8xf32, #tpu.memory_space<smem>>
    memref.store %16, %arg3[%c1_6] : memref<8xf32, #tpu.memory_space<smem>>
    %c2 = arith.constant 2 : index
    %18 = memref.load %arg1[%c2] : memref<8xi32, #tpu.memory_space<smem>>
    %c0_i32_7 = arith.constant 0 : i32
    %19 = arith.cmpi slt, %18, %c0_i32_7 : i32
    %c1001_i32_8 = arith.constant 1001 : i32
    %20 = arith.addi %18, %c1001_i32_8 : i32
    %21 = arith.select %19, %20, %18 : i32
    %c0_i32_9 = arith.constant 0 : i32
    %c1000_i32_10 = arith.constant 1000 : i32
    %22 = arith.maxsi %c0_i32_9, %21 : i32
    %23 = arith.minsi %c1000_i32_10, %22 : i32
    %24 = arith.index_cast %23 : i32 to index
    %25 = memref.load %arg2[%24] : memref<1001xf32, #tpu.memory_space<smem>>
    %c2_11 = arith.constant 2 : index
    %26 = memref.load %arg3[%c2_11] : memref<8xf32, #tpu.memory_space<smem>>
    memref.store %25, %arg3[%c2_11] : memref<8xf32, #tpu.memory_space<smem>>
    %c3 = arith.constant 3 : index
    %27 = memref.load %arg1[%c3] : memref<8xi32, #tpu.memory_space<smem>>
    %c0_i32_12 = arith.constant 0 : i32
    %28 = arith.cmpi slt, %27, %c0_i32_12 : i32
    %c1001_i32_13 = arith.constant 1001 : i32
    %29 = arith.addi %27, %c1001_i32_13 : i32
    %30 = arith.select %28, %29, %27 : i32
    %c0_i32_14 = arith.constant 0 : i32
    %c1000_i32_15 = arith.constant 1000 : i32
    %31 = arith.maxsi %c0_i32_14, %30 : i32
    %32 = arith.minsi %c1000_i32_15, %31 : i32
    %33 = arith.index_cast %32 : i32 to index
    %34 = memref.load %arg2[%33] : memref<1001xf32, #tpu.memory_space<smem>>
    %c3_16 = arith.constant 3 : index
    %35 = memref.load %arg3[%c3_16] : memref<8xf32, #tpu.memory_space<smem>>
    memref.store %34, %arg3[%c3_16] : memref<8xf32, #tpu.memory_space<smem>>
    %c4 = arith.constant 4 : index
    %36 = memref.load %arg1[%c4] : memref<8xi32, #tpu.memory_space<smem>>
    %c0_i32_17 = arith.constant 0 : i32
    %37 = arith.cmpi slt, %36, %c0_i32_17 : i32
    %c1001_i32_18 = arith.constant 1001 : i32
    %38 = arith.addi %36, %c1001_i32_18 : i32
    %39 = arith.select %37, %38, %36 : i32
    %c0_i32_19 = arith.constant 0 : i32
    %c1000_i32_20 = arith.constant 1000 : i32
    %40 = arith.maxsi %c0_i32_19, %39 : i32
    %41 = arith.minsi %c1000_i32_20, %40 : i32
    %42 = arith.index_cast %41 : i32 to index
    %43 = memref.load %arg2[%42] : memref<1001xf32, #tpu.memory_space<smem>>
    %c4_21 = arith.constant 4 : index
    %44 = memref.load %arg3[%c4_21] : memref<8xf32, #tpu.memory_space<smem>>
    memref.store %43, %arg3[%c4_21] : memref<8xf32, #tpu.memory_space<smem>>
    %c5 = arith.constant 5 : index
    %45 = memref.load %arg1[%c5] : memref<8xi32, #tpu.memory_space<smem>>
    %c0_i32_22 = arith.constant 0 : i32
    %46 = arith.cmpi slt, %45, %c0_i32_22 : i32
    %c1001_i32_23 = arith.constant 1001 : i32
    %47 = arith.addi %45, %c1001_i32_23 : i32
    %48 = arith.select %46, %47, %45 : i32
    %c0_i32_24 = arith.constant 0 : i32
    %c1000_i32_25 = arith.constant 1000 : i32
    %49 = arith.maxsi %c0_i32_24, %48 : i32
    %50 = arith.minsi %c1000_i32_25, %49 : i32
    %51 = arith.index_cast %50 : i32 to index
    %52 = memref.load %arg2[%51] : memref<1001xf32, #tpu.memory_space<smem>>
    %c5_26 = arith.constant 5 : index
    %53 = memref.load %arg3[%c5_26] : memref<8xf32, #tpu.memory_space<smem>>
    memref.store %52, %arg3[%c5_26] : memref<8xf32, #tpu.memory_space<smem>>
    %c6 = arith.constant 6 : index
    %54 = memref.load %arg1[%c6] : memref<8xi32, #tpu.memory_space<smem>>
    %c0_i32_27 = arith.constant 0 : i32
    %55 = arith.cmpi slt, %54, %c0_i32_27 : i32
    %c1001_i32_28 = arith.constant 1001 : i32
    %56 = arith.addi %54, %c1001_i32_28 : i32
    %57 = arith.select %55, %56, %54 : i32
    %c0_i32_29 = arith.constant 0 : i32
    %c1000_i32_30 = arith.constant 1000 : i32
    %58 = arith.maxsi %c0_i32_29, %57 : i32
    %59 = arith.minsi %c1000_i32_30, %58 : i32
    %60 = arith.index_cast %59 : i32 to index
    %61 = memref.load %arg2[%60] : memref<1001xf32, #tpu.memory_space<smem>>
    %c6_31 = arith.constant 6 : index
    %62 = memref.load %arg3[%c6_31] : memref<8xf32, #tpu.memory_space<smem>>
    memref.store %61, %arg3[%c6_31] : memref<8xf32, #tpu.memory_space<smem>>
    %c7 = arith.constant 7 : index
    %63 = memref.load %arg1[%c7] : memref<8xi32, #tpu.memory_space<smem>>
    %c0_i32_32 = arith.constant 0 : i32
    %64 = arith.cmpi slt, %63, %c0_i32_32 : i32
    %c1001_i32_33 = arith.constant 1001 : i32
    %65 = arith.addi %63, %c1001_i32_33 : i32
    %66 = arith.select %64, %65, %63 : i32
    %c0_i32_34 = arith.constant 0 : i32
    %c1000_i32_35 = arith.constant 1000 : i32
    %67 = arith.maxsi %c0_i32_34, %66 : i32
    %68 = arith.minsi %c1000_i32_35, %67 : i32
    %69 = arith.index_cast %68 : i32 to index
    %70 = memref.load %arg2[%69] : memref<1001xf32, #tpu.memory_space<smem>>
    %c7_36 = arith.constant 7 : index
    %71 = memref.load %arg3[%c7_36] : memref<8xf32, #tpu.memory_space<smem>>
    memref.store %70, %arg3[%c7_36] : memref<8xf32, #tpu.memory_space<smem>>
    return
  }
  func.func @transform_0(%arg0: i32, %arg1: memref<8xi32, #tpu.memory_space<smem>>) -> i32 {
    %c0_i32 = arith.constant 0 : i32
    %c0_i32_0 = arith.constant 0 : i32
    return %c0_i32 : i32
  }
  func.func @transform_1(%arg0: i32, %arg1: memref<8xi32, #tpu.memory_space<smem>>) -> i32 {
    %c0_i32 = arith.constant 0 : i32
    %c0_i32_0 = arith.constant 0 : i32
    return %c0_i32 : i32
  }
}

</mosaic_0001>

<bundles_post_ra>
// kernel: _forward_impl.1
= control target key start
LH: loop header
LB: loop body
LE: loop exit
PB: predicated region body
PF: predicated region fallthrough
CT: control target
= control target key end

     0   :  { %s303_s0 = inlined_call_operand.hbm [shape: s32[8], index: 0, kind: input, shape index: {}]   ;;  %s304_s1 = inlined_call_operand.hbm [shape: f32[1001], index: 1, kind: input, shape index: {}]   ;;  %s305_s2 = inlined_call_operand.hbm [shape: f32[8], index: 2, kind: output, shape index: {}]  }
   0x1   :  { %s193_s11 = scalar_lea.hbm %s303_s0, 16 }
   0x2   :  { %p194_p0 = scmp.ne.s32.totalorder %s303_s0, %s193_s11  ;;  %p197_p1 = scmp.lt.u32.totalorder %s193_s11, %s303_s0 }
   0x4   :  { %p199_p2 = pnand %p197_p1, %p194_p0 }
   0x6   :  { %202 = shalt.err (!%p199_p2)  }
   0x7   :  { %s229_s16 = smov [#allocation3]  }
   0x8   :  { %8 = dma.hbm_to_smem %s303_s0, 16, %s229_s16, [#allocation2] }
   0x9   :  { %223 = dma.done.wait [#allocation2], 16 }
   0xa   :  { %224 = vsyncadd [#allocation2], 4294967280 }
   0xb   :  { %10 = sfence }
   0xc   :  { %11 = vsyncpa [#allocation5], 0 }
   0xd   :  { %12 = vsyncpa [#allocation6], 0  ;;  %s203_s21 = scalar_lea.hbm %s304_s1, 128 }
   0xe   :  { %p204_p3 = scmp.ne.s32.totalorder %s304_s1, %s203_s21  ;;  %p207_p4 = scmp.lt.u32.totalorder %s203_s21, %s304_s1 }
  0x10   :  { %p209_p5 = pnand %p207_p4, %p204_p3 }
  0x12   :  { %212 = shalt.err (!%p209_p5)
}
  0x13   :  { %s230_s0 = smov [#allocation4]  }
  0x14   :  { %20 = dma.hbm_to_smem %s304_s1, 128, %s230_s0, [#allocation5]  }
  0x15   :  { %225 = dma.done.wait [#allocation5], 128  }
  0x16   :  { %226 = vsyncadd [#allocation5], 4294967168 }
  0x17   :  { %24 = sfence }
  0x18   :  { %s25_s28 = sld [smem:[#allocation3]]  ;;  %s132_s29 = sld [smem:[#allocation3 + $0x1]] }
  0x19   :  { %s138_s30 = sld [smem:[#allocation3 + $0x2]]  ;;  %s144_s3 = sld [smem:[#allocation3 + $0x3]] }
  0x1a   :  { %s271_s4 = sld [smem:[#allocation3 + $0x4]]  ;;  %s273_s5 = sld [smem:[#allocation3 + $0x5]] }
  0x1b   :  { %s275_s6 = sld [smem:[#allocation3 + $0x6]]  ;;  %s277_s7 = sld [smem:[#allocation3 + $0x7]] }
  0x1c   :  { %s213_s0 = scalar_lea.hbm %s305_s2, 16 }
  0x1e   :  { %p26_p6 = scmp.lt.s32.totalorder %s25_s28, 0  ;;  %s27_s8 = sadd.s32 1001, %s25_s28 }
  0x1f   :  { %p37_p7 = scmp.lt.s32.totalorder %s132_s29, 0  ;;  %s38_s9 = sadd.s32 1001, %s132_s29 }
  0x20   :  { %s307_s8 = smov (!%p26_p6, %s27_s8), %s25_s28  ;;  %p48_p12 = scmp.lt.s32.totalorder %s138_s30, 0 }
  0x21   :  { %s309_s9 = smov (!%p37_p7, %s38_s9), %s132_s29  ;;  %p29_p8 = scmp.gt.s32.totalorder %s307_s8, 0 }
  0x22   :  { %p127_p9 = scmp.lt.s32.totalorder %s307_s8, 1000  ;;  %p40_p10 = scmp.gt.s32.totalorder %s309_s9, 0 }
  0x23   :  { %p133_p11 = scmp.lt.s32.totalorder %s309_s9, 1000  ;;  %s311_s8 = smov (!%p29_p8, %s307_s8), 0 }
  0x24   :  { %s313_s9 = smov (!%p40_p10, %s309_s9), 0  ;;  %s315_s8 = smov (!%p127_p9, %s311_s8), 1000 }
  0x25   :  { %s317_s9 = smov (!%p133_p11, %s313_s9), 1000  ;;  %s33_s1 = sld [smem:[#allocation4 + %s315_s8]] }
  0x26   :  { %s44_s10 = sld [smem:[#allocation4 + %s317_s9]]  ;;  %s49_s11 = sadd.s32 1001, %s138_s30 }
  0x27   :  { %s319_s11 = smov (!%p48_p12, %s49_s11), %s138_s30  ;;  %p59_p13 = scmp.lt.s32.totalorder %s144_s3, 0 }
  0x28   :  { %s60_s12 = sadd.s32 1001, %s144_s3  ;;  %p51_p0 = scmp.gt.s32.totalorder %s319_s11, 0 }
  0x29   :  { %p139_p1 = scmp.lt.s32.totalorder %s319_s11, 1000  ;;  %s321_s12 = smov (!%p59_p13, %s60_s12), %s144_s3 }
  0x2a   :  { %p70_p2 = scmp.lt.s32.totalorder %s271_s4, 0  ;;  %p62_p3 = scmp.gt.s32.totalorder %s321_s12, 0 }
  0x2b   :  { %35 = sst [smem:[#allocation7]] %s33_s1  ;;  %s323_s11 = smov (!%p51_p0, %s319_s11), 0 }
  0x2c   :  { %46 = sst [smem:[#allocation7 + $0x1]] %s44_s10  ;;  %s325_s11 = smov (!%p139_p1, %s323_s11), 1000 }
  0x2d   :  { %s63_s13 = scalar_select %p62_p3, %s321_s12, 0 }
  0x2e   :  { %p145_p4 = scmp.lt.s32.totalorder %s321_s12, 1000  ;;  %s71_s14 = sadd.s32 1001, %s271_s4 }
  0x2f   :  { %s55_s15 = sld [smem:[#allocation4 + %s325_s11]]  ;;  %p81_p5 = scmp.lt.s32.totalorder %s273_s5, 0 }
  0x30   :  { %s327_s13 = smov (!%p145_p4, %s63_s13), 1000  ;;  %s329_s14 = smov (!%p70_p2, %s71_s14), %s271_s4 }
  0x31   :  { %s66_s16 = sld [smem:[#allocation4 + %s327_s13]]  ;;  %s82_s17 = sadd.s32 1001, %s273_s5 }
  0x32   :  { %p73_p6 = scmp.gt.s32.totalorder %s329_s14, 0  ;;  %p151_p7 = scmp.lt.s32.totalorder %s329_s14, 1000 }
  0x33   :  { %s331_s17 = smov (!%p81_p5, %s82_s17), %s273_s5  ;;  %p92_p8 = scmp.lt.s32.totalorder %s275_s6, 0 }
  0x34   :  { %s333_s14 = smov (!%p73_p6, %s329_s14), 0  ;;  %p84_p9 = scmp.gt.s32.totalorder %s331_s17, 0 }
  0x35   :  { %57 = sst [smem:[#allocation7 + $0x2]] %s55_s15  ;;  %p157_p10 = scmp.lt.s32.totalorder %s331_s17, 1000 }
  0x36   :  { %s93_s18 = sadd.s32 1001, %s275_s6  ;;  %s335_s14 = smov (!%p151_p7, %s333_s14), 1000 }
  0x37   :  { %68 = sst [smem:[#allocation7 + $0x3]] %s66_s16  ;;  %s337_s17 = smov (!%p84_p9, %s331_s17), 0 }
  0x38   :  { %s77_s19 = sld [smem:[#allocation4 + %s335_s14]]  ;;  %p103_p11 = scmp.lt.s32.totalorder %s277_s7, 0 }
  0x39   :  { %s339_s17 = smov (!%p157_p10, %s337_s17), 1000  ;;  %s341_s18 = smov (!%p92_p8, %s93_s18), %s275_s6 }
  0x3a   :  { %s88_s20 = sld [smem:[#allocation4 + %s339_s17]]  ;;  %s104_s21 = sadd.s32 1001, %s277_s7 }
  0x3b   :  { %p95_p12 = scmp.gt.s32.totalorder %s341_s18, 0  ;;  %s343_s21 = smov (!%p103_p11, %s104_s21), %s277_s7 }
  0x3c   :  { %p163_p13 = scmp.lt.s32.totalorder %s341_s18, 1000  ;;  %p106_p0 = scmp.gt.s32.totalorder %s343_s21, 0 }
  0x3d   :  { %s345_s18 = smov (!%p95_p12, %s341_s18), 0  ;;  %p169_p1 = scmp.lt.s32.totalorder %s343_s21, 1000 }
  0x3e   :  { %79 = sst [smem:[#allocation7 + $0x4]] %s77_s19  ;;  %s347_s18 = smov (!%p163_p13, %s345_s18), 1000 }
  0x3f   :  { %s349_s21 = smov (!%p106_p0, %s343_s21), 0  ;;  %s99_s22 = sld [smem:[#allocation4 + %s347_s18]] }
  0x40   :  { %90 = sst [smem:[#allocation7 + $0x5]] %s88_s20  ;;  %s351_s21 = smov (!%p169_p1, %s349_s21), 1000 }
  0x41   :  { %s110_s23 = sld [smem:[#allocation4 + %s351_s21]]  ;;  %p214_p2 = scmp.ne.s32.totalorder %s305_s2, %s213_s0 }
  0x42   :  { %p217_p3 = scmp.lt.u32.totalorder %s213_s0, %s305_s2 }
  0x44   :  { %p219_p4 = pnand %p217_p3, %p214_p2 }
  0x45   :  { %101 = sst [smem:[#allocation7 + $0x6]] %s99_s22 }
  0x47   :  { %112 = sst [smem:[#allocation7 + $0x7]] %s110_s23 }
  0x48   :  { %222 = shalt.err (!%p219_p4)
}
  0x49   :  { %s231_s30 = smov [#allocation7]  }
  0x4a   :  { %120 = dma.smem_to_hbm %s231_s30, 16, %s305_s2, [#allocation6]  }
  0x4b   :  { %227 = dma.done.wait [#allocation6], 16  }
  0x4c   :  { %228 = vsyncadd [#allocation6], 4294967280 }
  0x4d   :  { %124 = sfence }
  0x4e   :  { %125 = vsyncpa [#allocation5], 1 }
  0x4f   :  { %126 = vsyncpa [#allocation6], 1 }

</bundles_post_ra>
